<compile_context>
chip_gen: v6e
topology: v6e:2x2x1
jax: 0.10.0
libtpu: 0.0.40
codegen_flags: <defaults>
</compile_context>

<pallas_src>
import jax
import jax.numpy as jnp
from jax.experimental import pallas as pl
from jax.experimental.pallas import tpu as pltpu


D_IN = 28 * 28      # 784
H1 = 128
H2_PAD = 128        # layer-2 outputs padded 64 -> 128 (zero columns)
OUT_PAD = 128       # layer-3 outputs padded 10 -> 128 (zero columns)


def _round_up(n, m):
    return ((n + m - 1) // m) * m


def mlp_kernel(x_ref, w1_ref, b1_ref, w2_ref, b2_ref, w3_ref, b3_ref, o_ref):
    # Layer 1: [TB,784]bf16 @ [784,128]bf16 -> f32 acc, bias + ReLU in f32
    h1 = jnp.dot(x_ref[...], w1_ref[...], preferred_element_type=jnp.float32)
    h1 = jnp.maximum(h1 + b1_ref[...], 0.0)
    # Layer 2 (padded to 128 lanes): zero-padded columns stay exactly 0 after ReLU
    h2 = jnp.dot(h1.astype(jnp.bfloat16), w2_ref[...],
                 preferred_element_type=jnp.float32)
    h2 = jnp.maximum(h2 + b2_ref[...], 0.0)
    # Layer 3 (padded to 128 lanes): lane-dense unmasked store of the full block
    logits = jnp.dot(h2.astype(jnp.bfloat16), w3_ref[...],
                     preferred_element_type=jnp.float32)
    o_ref[...] = (logits + b3_ref[...]).astype(o_ref.dtype)


def mnist_classifier_forward(x_nchw, params):
    """x_nchw: [B, 1, 28, 28] float32. Returns logits [B, 10] float32."""
    w1, b1, w2, b2, w3, b3 = params
    B = x_nchw.shape[0]

    # nn.Flatten + dtype / padding prep (plain JAX glue, outside the kernel).
    x_flat = x_nchw.reshape(B, D_IN).astype(jnp.bfloat16)
    w1b = w1.astype(jnp.bfloat16)                                        # [784,128]
    w2b = jnp.pad(w2, ((0, 0), (0, H2_PAD - w2.shape[1]))               # [128,128]
                  ).astype(jnp.bfloat16)
    b2p = jnp.pad(b2, ((0, 0), (0, H2_PAD - b2.shape[1])))              # [1,128] f32
    w3b = jnp.pad(w3, ((0, H2_PAD - w3.shape[0]),
                       (0, OUT_PAD - w3.shape[1]))).astype(jnp.bfloat16)  # [128,128]
    b3p = jnp.pad(b3, ((0, 0), (0, OUT_PAD - b3.shape[1])))             # [1,128] f32

    # Batch tile: large enough to hit HBM roofline, capped by the actual batch.
    TB = min(512, _round_up(B, 8))
    grid = (pl.cdiv(B, TB),)

    const = lambda shape: pl.BlockSpec(shape, lambda i: (0, 0))

    flops = 2 * B * (D_IN * H1 + H1 * H2_PAD + H2_PAD * OUT_PAD)
    bytes_accessed = (B * D_IN * 2                                   # bf16 inputs
                      + (D_IN * H1 + H1 * H2_PAD + H2_PAD * OUT_PAD) * 2  # bf16 weights
                      + (H1 + H2_PAD + OUT_PAD) * 4                  # f32 biases
                      + B * OUT_PAD * 4)                             # f32 output

    out_padded = pl.pallas_call(
        mlp_kernel,
        out_shape=jax.ShapeDtypeStruct((B, OUT_PAD), jnp.float32),
        grid_spec=pltpu.PrefetchScalarGridSpec(
            num_scalar_prefetch=0,
            grid=grid,
            in_specs=[
                pl.BlockSpec((TB, D_IN), lambda i: (i, 0)),   # x tile (streamed)
                const((D_IN, H1)), const((1, H1)),            # layer 1 (resident)
                const((H1, H2_PAD)), const((1, H2_PAD)),      # layer 2 (resident)
                const((H2_PAD, OUT_PAD)), const((1, OUT_PAD)),# layer 3 (resident)
            ],
            out_specs=pl.BlockSpec((TB, OUT_PAD), lambda i: (i, 0)),
        ),
        compiler_params=pltpu.CompilerParams(
            dimension_semantics=("parallel",)),
        cost_estimate=pl.CostEstimate(
            flops=flops, transcendentals=0, bytes_accessed=bytes_accessed),
    )(x_flat, w1b, b1, w2b, b2p, w3b, b3p)

    return out_padded[:, :10]


def init_params(key):
    """Deterministic init mimicking nn.Linear's U(-1/sqrt(fan_in), 1/sqrt(fan_in)).
    Weights stored as [in_features, out_features] (transpose of PyTorch layout)."""
    dims = [(D_IN, 128), (128, 64), (64, 10)]
    params = []
    keys = jax.random.split(key, 2 * len(dims))
    for i, (fan_in, fan_out) in enumerate(dims):
        bound = 1.0 / jnp.sqrt(fan_in)
        w = jax.random.uniform(keys[2 * i], (fan_in, fan_out), jnp.float32,
                               minval=-bound, maxval=bound)
        b = jax.random.uniform(keys[2 * i + 1], (1, fan_out), jnp.float32,
                               minval=-bound, maxval=bound)
        params += [w, b]
    return tuple(params)


if __name__ == "__main__":
    key = jax.random.PRNGKey(0)
    k_x, k_p = jax.random.split(key)

    B = 8
    x = jax.random.normal(k_x, (B, 1, 28, 28), dtype=jnp.float32)  # NCHW like MNIST
    params = init_params(k_p)

    logits = mnist_classifier_forward(x, params)
    jax.block_until_ready(logits)

    # Reference in plain JAX using the same bf16-activation / f32-accumulate math.
    w1, b1, w2, b2, w3, b3 = params
    xb = x.reshape(B, -1).astype(jnp.bfloat16)
    h = jnp.maximum(jnp.dot(xb, w1.astype(jnp.bfloat16),
                            preferred_element_type=jnp.float32) + b1, 0.0)
    h = jnp.maximum(jnp.dot(h.astype(jnp.bfloat16), w2.astype(jnp.bfloat16),
                            preferred_element_type=jnp.float32) + b2, 0.0)
    ref = jnp.dot(h.astype(jnp.bfloat16), w3.astype(jnp.bfloat16),
                  preferred_element_type=jnp.float32) + b3

    assert logits.shape == (B, 10)
    assert jnp.allclose(logits, ref, atol=1e-2, rtol=1e-2)

    print("KERNEL_OK")
</pallas_src>

<mosaic_0001>
module attributes {stable_mosaic.version = 11 : i64} {
  func.func @mlp_kernel(%arg0: i32, %arg1: memref<8x784xbf16, #tpu.memory_space<vmem>>, %arg2: memref<784x128xbf16, #tpu.memory_space<vmem>>, %arg3: memref<1x128xf32, #tpu.memory_space<vmem>>, %arg4: memref<128x128xbf16, #tpu.memory_space<vmem>>, %arg5: memref<1x128xf32, #tpu.memory_space<vmem>>, %arg6: memref<128x128xbf16, #tpu.memory_space<vmem>>, %arg7: memref<1x128xf32, #tpu.memory_space<vmem>>, %arg8: memref<8x128xf32, #tpu.memory_space<vmem>>) attributes {dimension_semantics = [#tpu.dimension_semantics<parallel>], iteration_bounds = array<i64: 1>, scalar_prefetch = 0 : i64, scratch_operands = 0 : i64, tpu.core_type = #tpu.core_type<tc>, window_params = [{transform_indices = @transform_0, window_bounds = array<i64: 8, 784>}, {pipeline_mode = #tpu.pipeline_mode<synchronous>, transform_indices = @transform_1, window_bounds = array<i64: 784, 128>}, {pipeline_mode = #tpu.pipeline_mode<synchronous>, transform_indices = @transform_2, window_bounds = array<i64: 1, 128>}, {pipeline_mode = #tpu.pipeline_mode<synchronous>, transform_indices = @transform_3, window_bounds = array<i64: 128, 128>}, {pipeline_mode = #tpu.pipeline_mode<synchronous>, transform_indices = @transform_4, window_bounds = array<i64: 1, 128>}, {pipeline_mode = #tpu.pipeline_mode<synchronous>, transform_indices = @transform_5, window_bounds = array<i64: 128, 128>}, {pipeline_mode = #tpu.pipeline_mode<synchronous>, transform_indices = @transform_6, window_bounds = array<i64: 1, 128>}, {transform_indices = @transform_7, window_bounds = array<i64: 8, 128>}]} {
    %c0 = arith.constant 0 : index
    %c0_0 = arith.constant 0 : index
    %0 = vector.load %arg1[%c0, %c0_0] : memref<8x784xbf16, #tpu.memory_space<vmem>>, vector<8x784xbf16>
    %c0_1 = arith.constant 0 : index
    %c0_2 = arith.constant 0 : index
    %1 = vector.load %arg2[%c0_1, %c0_2] : memref<784x128xbf16, #tpu.memory_space<vmem>>, vector<784x128xbf16>
    %cst = arith.constant dense<0.000000e+00> : vector<8x128xf32>
    %2 = tpu.matmul %0, %1, %cst {dimension_numbers = #tpu.dot_dimension_numbers<[1], [0], [0], [1], [0, 0, 1, 1], [], []>} : vector<8x784xbf16>, vector<784x128xbf16>, vector<8x128xf32> -> vector<8x128xf32>
    %c0_3 = arith.constant 0 : index
    %c0_4 = arith.constant 0 : index
    %3 = vector.load %arg3[%c0_3, %c0_4] : memref<1x128xf32, #tpu.memory_space<vmem>>, vector<1x128xf32>
    %4 = vector.broadcast %3 : vector<1x128xf32> to vector<8x128xf32>
    %5 = arith.addf %2, %4 : vector<8x128xf32>
    %cst_5 = arith.constant 0.000000e+00 : f32
    %6 = vector.broadcast %cst_5 : f32 to vector<8x128xf32>
    %7 = arith.maximumf %5, %6 : vector<8x128xf32>
    %8 = arith.truncf %7 : vector<8x128xf32> to vector<8x128xbf16>
    %c0_6 = arith.constant 0 : index
    %c0_7 = arith.constant 0 : index
    %9 = vector.load %arg4[%c0_6, %c0_7] : memref<128x128xbf16, #tpu.memory_space<vmem>>, vector<128x128xbf16>
    %cst_8 = arith.constant dense<0.000000e+00> : vector<8x128xf32>
    %10 = tpu.matmul %8, %9, %cst_8 {dimension_numbers = #tpu.dot_dimension_numbers<[1], [0], [0], [1], [0, 0, 1, 1], [], []>} : vector<8x128xbf16>, vector<128x128xbf16>, vector<8x128xf32> -> vector<8x128xf32>
    %c0_9 = arith.constant 0 : index
    %c0_10 = arith.constant 0 : index
    %11 = vector.load %arg5[%c0_9, %c0_10] : memref<1x128xf32, #tpu.memory_space<vmem>>, vector<1x128xf32>
    %12 = vector.broadcast %11 : vector<1x128xf32> to vector<8x128xf32>
    %13 = arith.addf %10, %12 : vector<8x128xf32>
    %cst_11 = arith.constant 0.000000e+00 : f32
    %14 = vector.broadcast %cst_11 : f32 to vector<8x128xf32>
    %15 = arith.maximumf %13, %14 : vector<8x128xf32>
    %16 = arith.truncf %15 : vector<8x128xf32> to vector<8x128xbf16>
    %c0_12 = arith.constant 0 : index
    %c0_13 = arith.constant 0 : index
    %17 = vector.load %arg6[%c0_12, %c0_13] : memref<128x128xbf16, #tpu.memory_space<vmem>>, vector<128x128xbf16>
    %cst_14 = arith.constant dense<0.000000e+00> : vector<8x128xf32>
    %18 = tpu.matmul %16, %17, %cst_14 {dimension_numbers = #tpu.dot_dimension_numbers<[1], [0], [0], [1], [0, 0, 1, 1], [], []>} : vector<8x128xbf16>, vector<128x128xbf16>, vector<8x128xf32> -> vector<8x128xf32>
    %c0_15 = arith.constant 0 : index
    %c0_16 = arith.constant 0 : index
    %19 = vector.load %arg7[%c0_15, %c0_16] : memref<1x128xf32, #tpu.memory_space<vmem>>, vector<1x128xf32>
    %20 = vector.broadcast %19 : vector<1x128xf32> to vector<8x128xf32>
    %21 = arith.addf %18, %20 : vector<8x128xf32>
    %c0_17 = arith.constant 0 : index
    %c0_18 = arith.constant 0 : index
    %22 = vector.load %arg8[%c0_17, %c0_18] : memref<8x128xf32, #tpu.memory_space<vmem>>, vector<8x128xf32>
    tpu.vector_store %arg8[%c0_17, %c0_18], %21 {strides = array<i32>} : memref<8x128xf32, #tpu.memory_space<vmem>>, vector<8x128xf32>,
    return
  }
  func.func @transform_0(%arg0: i32) -> (i32, i32) {
    %c0_i32 = arith.constant 0 : i32
    %c0_i32_0 = arith.constant 0 : i32
    return %arg0, %c0_i32 : i32, i32
  }
  func.func @transform_1(%arg0: i32) -> (i32, i32) {
    %c0_i32 = arith.constant 0 : i32
    %c0_i32_0 = arith.constant 0 : i32
    %c0_i32_1 = arith.constant 0 : i32
    return %c0_i32, %c0_i32_0 : i32, i32
  }
  func.func @transform_2(%arg0: i32) -> (i32, i32) {
    %c0_i32 = arith.constant 0 : i32
    %c0_i32_0 = arith.constant 0 : i32
    %c0_i32_1 = arith.constant 0 : i32
    return %c0_i32, %c0_i32_0 : i32, i32
  }
  func.func @transform_3(%arg0: i32) -> (i32, i32) {
    %c0_i32 = arith.constant 0 : i32
    %c0_i32_0 = arith.constant 0 : i32
    %c0_i32_1 = arith.constant 0 : i32
    return %c0_i32, %c0_i32_0 : i32, i32
  }
  func.func @transform_4(%arg0: i32) -> (i32, i32) {
    %c0_i32 = arith.constant 0 : i32
    %c0_i32_0 = arith.constant 0 : i32
    %c0_i32_1 = arith.constant 0 : i32
    return %c0_i32, %c0_i32_0 : i32, i32
  }
  func.func @transform_5(%arg0: i32) -> (i32, i32) {
    %c0_i32 = arith.constant 0 : i32
    %c0_i32_0 = arith.constant 0 : i32
    %c0_i32_1 = arith.constant 0 : i32
    return %c0_i32, %c0_i32_0 : i32, i32
  }
  func.func @transform_6(%arg0: i32) -> (i32, i32) {
    %c0_i32 = arith.constant 0 : i32
    %c0_i32_0 = arith.constant 0 : i32
    %c0_i32_1 = arith.constant 0 : i32
    return %c0_i32, %c0_i32_0 : i32, i32
  }
  func.func @transform_7(%arg0: i32) -> (i32, i32) {
    %c0_i32 = arith.constant 0 : i32
    %c0_i32_0 = arith.constant 0 : i32
    return %arg0, %c0_i32 : i32, i32
  }
}

</mosaic_0001>

<bundles_post_ra>
// kernel: tpu_custom_call.1
= control target key start
LH: loop header
LB: loop body
LE: loop exit
PB: predicated region body
PF: predicated region fallthrough
CT: control target
= control target key end

     0   :  { %12 = vsyncpa [#allocation3], 0  ;;  %s1418_s0 = inlined_call_operand.hbm [shape: bf16[8,784], index: 0, kind: input, shape index: {}]   ;;  %s1419_s1 = inlined_call_operand.hbm [shape: bf16[784,128], index: 1, kind: input, shape index: {}]   ;;  %s1420_s2 = inlined_call_operand.vmem [shape: f32[1,128], index: 2, kind: input, shape index: {}]   ;;  %s1421_s3 = inlined_call_operand.hbm [shape: bf16[128,128], index: 3, kind: input, shape index: {}]   ;;  %s1422_s4 = inlined_call_operand.vmem [shape: f32[1,128], index: 4, kind: input, shape index: {}]   ;;  %s1423_s5 = inlined_call_operand.hbm [shape: bf16[128,128], index: 5, kind: input, shape index: {}]   ;;  %s1424_s6 = inlined_call_operand.vmem [shape: f32[1,128], index: 6, kind: input, shape index: {}]   ;;  %s1425_s7 = inlined_call_operand.hbm [shape: f32[8,128], index: 7, kind: output, shape index: {}]  }
   0x1   :  { %13 = vsyncpa [#allocation6], 0 }
   0x2   :  { %14 = vsyncpa [#allocation9], 0 }
   0x3   :  { %15 = vsyncpa [#allocation4], 0  ;;  %s1313_s24 = smov [#allocation5]  }
   0x4   :  { %s31_s25 = sshll.u32 %s1313_s24, 4  ;;  %s32_s25 = int_to_ptr.vmem [resolvable:$true] %s31_s25 }
   0x5   :  { %s1213_s26 = scalar_lea.vmem %s32_s25, 6272  ;;  %p1218_p1 = scmp.lt.s32.totalorder %s32_s25, %s32_s25 }
   0x6   :  { %p1214_p0 = scmp.ne.s32.totalorder %s32_s25, %s1213_s26  ;;  %p1219_p2 = scmp.lt.s32.totalorder %s1213_s26, %s1213_s26 }
   0x8   :  { %p1220_p3 = por %p1219_p2, %p1218_p1 }
   0xa   :  { %p1221_p4 = pnand %p1220_p3, %p1214_p0 }
   0xc   :  { %1224 = shalt.err (!%p1221_p4)
}
   0xd   :  { %s1314_s27 = smov 64   ;;  %s1315_s28 = smov 4  }
   0xe   :  { %37 = dma.hbm_to_vmem [thread:$0]  %s1419_s1, 6272, %s32_s25, [#allocation6], %s1314_s27, %s1314_s27, %s1315_s28  }
   0xf   :  { %s1316_s8 = smov [#allocation2]   ;;  %s1317_s10 = smov [#allocation7]  }
  0x10   :  { %s22_s9 = sshll.u32 %s1316_s8, 4  ;;  %s45_s11 = sshll.u32 %s1317_s10, 4  ;;  %s23_s9 = int_to_ptr.vmem [resolvable:$true] %s22_s9  ;;  %s46_s11 = int_to_ptr.vmem [resolvable:$true] %s45_s11 }
  0x11   :  { %s1233_s12 = scalar_lea.vmem %s23_s9, 448  ;;  %p1238_p6 = scmp.lt.s32.totalorder %s23_s9, %s23_s9 }
  0x12   :  { %p1234_p5 = scmp.ne.s32.totalorder %s23_s9, %s1233_s12  ;;  %p1239_p7 = scmp.lt.s32.totalorder %s1233_s12, %s1233_s12 }
  0x14   :  { %p1240_p8 = por %p1239_p7, %p1238_p6 }
  0x16   :  { %p1241_p9 = pnand %p1240_p8, %p1234_p5 }
  0x18   :  { %1244 = shalt.err (!%p1241_p9)
}
  0x19   :  { %25 = dma.hbm_to_vmem [thread:$0]  %s1418_s0, 448, %s23_s9, [#allocation3]  }
  0x1a   :  { %s1253_s15 = scalar_lea.vmem %s46_s11, 1024  ;;  %p1258_p11 = scmp.lt.s32.totalorder %s46_s11, %s46_s11 }
  0x1b   :  { %p1254_p10 = scmp.ne.s32.totalorder %s46_s11, %s1253_s15  ;;  %p1259_p12 = scmp.lt.s32.totalorder %s1253_s15, %s1253_s15 }
  0x1d   :  { %p1260_p13 = por %p1259_p12, %p1258_p11 }
  0x1f   :  { %p1261_p0 = pnand %p1260_p13, %p1254_p10 }
  0x21   :  { %1264 = shalt.err (!%p1261_p0)
}
  0x22   :  { %51 = dma.hbm_to_vmem [thread:$0]  %s1421_s3, 1024, %s46_s11, [#allocation6], %s1314_s27, %s1314_s27, %s1315_s28  }
  0x23   :  { %s1318_s17 = smov [#allocation8]  }
  0x24   :  { %s59_s18 = sshll.u32 %s1318_s17, 4  ;;  %s60_s18 = int_to_ptr.vmem [resolvable:$true] %s59_s18 }
  0x25   :  { %s1273_s19 = scalar_lea.vmem %s60_s18, 1024  ;;  %p1278_p2 = scmp.lt.s32.totalorder %s60_s18, %s60_s18 }
  0x26   :  { %p1274_p1 = scmp.ne.s32.totalorder %s60_s18, %s1273_s19  ;;  %p1279_p3 = scmp.lt.s32.totalorder %s1273_s19, %s1273_s19 }
  0x28   :  { %p1280_p4 = por %p1279_p3, %p1278_p2 }
  0x2a   :  { %p1281_p5 = pnand %p1280_p4, %p1274_p1 }
  0x2c   :  { %1284 = shalt.err (!%p1281_p5)
}
  0x2d   :  { %65 = dma.hbm_to_vmem [thread:$0]  %s1423_s5, 1024, %s60_s18, [#allocation9], %s1314_s27, %s1314_s27, %s1315_s28  }
  0x2e   :  { %1305 = dma.done.wait [#allocation3], 448  }
  0x2f   :  { %1306 = vsyncadd [#allocation3], 4294966848 }
  0x30   :  { %1307 = dma.done.wait [#allocation6], 7296  }
  0x31   :  { %1308 = vsyncadd [#allocation6], 4294960000 }
  0x32   :  { %1309 = dma.done.wait [#allocation9], 1024  }
  0x33   :  { %1310 = vsyncadd [#allocation9], 4294966272  ;;  %v1133_v0 = vld [vmem:[#allocation5 + $0x78] sm:$0xff]   ;;  %v1137_v4 = vld [vmem:[#allocation5 + $0x70] sm:$0xff]   ;;  %v1319_v43 = vmov 0.0   ;;  %vm1320_vm0 = vmmov 0  }
  0x34   :  { %v1134_v1 = vld [vmem:[#allocation5 + $0x38] sm:$0xff]   ;;  %992 = vmatprep.subr.bf16.mxu0 %v1133_v0  ;;  %v1138_v5 = vld [vmem:[#allocation5 + $0x30] sm:$0xff]   ;;  %v1141_v8 = vld [vmem:[#allocation5 + $0x68] sm:$0xff]   ;;  %vm508_vm1 = vcmask 130048   ;;  %s1321_s24 = smov [#allocation10]  }
  0x35   :  { %v1135_v2 = vld [vmem:[#allocation5 + $0xf8] sm:$0xff]   ;;  %993 = vmatpush3.bf16.msra.mxu0 %v1134_v1  ;;  %v1139_v6 = vld [vmem:[#allocation5 + $0xf0] sm:$0xff]   ;;  %v1142_v9 = vld [vmem:[#allocation5 + $0x28] sm:$0xff]   ;;  %s905_s25 = sshll.u32 %s1321_s24, 4  ;;  %s906_s25 = int_to_ptr.vmem [resolvable:$true] %s905_s25 }
  0x36   :  { %v1136_v3 = vld [vmem:[#allocation5 + $0xb8] sm:$0xff]   ;;  %1014 = vmatprep.subr.bf16.mxu1 %v1135_v2  ;;  %994 = vmatprep.subr.bf16.mxu0 %v1137_v4  ;;  %v1140_v7 = vld [vmem:[#allocation5 + $0xb0] sm:$0xff]   ;;  %v1143_v10 = vld [vmem:[#allocation5 + $0xe8] sm:$0xff]   ;;  %p1290_p7 = scmp.lt.s32.totalorder %s906_s25, %s906_s25 }
  0x37   :  { %1015 = vmatpush3.bf16.msra.mxu1 %v1136_v3  ;;  %v1144_v11 = vld [vmem:[#allocation5 + $0xa8] sm:$0xff]   ;;  %v1145_v12 = vld [vmem:[#allocation5 + $0x60] sm:$0xff]   ;;  %v1149_v16 = vld [vmem:[#allocation5 + $0x58] sm:$0xff]  }
  0x38   :  { %1016 = vmatprep.subr.bf16.mxu1 %v1139_v6  ;;  %v1146_v13 = vld [vmem:[#allocation5 + $0x20] sm:$0xff]   ;;  %v1150_v17 = vld [vmem:[#allocation5 + $0x18] sm:$0xff]   ;;  %v1153_v20 = vld [vmem:[#allocation5 + $0x50] sm:$0xff]  }
  0x39   :  { %995 = vmatpush3.bf16.msra.mxu0 %v1138_v5  ;;  %v1147_v14 = vld [vmem:[#allocation5 + $0xe0] sm:$0xff]   ;;  %v1151_v18 = vld [vmem:[#allocation5 + $0xd8] sm:$0xff]   ;;  %v1154_v21 = vld [vmem:[#allocation5 + $0x10] sm:$0xff]  }
  0x3a   :  { %996 = vmatprep.subr.bf16.mxu0 %v1141_v8  ;;  %v1148_v15 = vld [vmem:[#allocation5 + $0xa0] sm:$0xff]   ;;  %v1152_v19 = vld [vmem:[#allocation5 + $0x98] sm:$0xff]   ;;  %v1155_v22 = vld [vmem:[#allocation5 + $0xd0] sm:$0xff]  }
  0x3b   :  { %1017 = vmatpush3.bf16.msra.mxu1 %v1140_v7  ;;  %v1156_v23 = vld [vmem:[#allocation5 + $0x90] sm:$0xff]   ;;  %v1157_v24 = vld [vmem:[#allocation5 + $0x48] sm:$0xff]   ;;  %v1161_v28 = vld [vmem:[#allocation5 + $0x40] sm:$0xff]  }
  0x3c   :  { %1018 = vmatprep.subr.bf16.mxu1 %v1143_v10  ;;  %v1158_v25 = vld [vmem:[#allocation5 + $0x8] sm:$0xff]   ;;  %v1162_v29 = vld [vmem:[#allocation5] sm:$0xff]   ;;  %v1167_v35 = vld [vmem:[#allocation5 + $0x178] sm:$0xff]  }
  0x3d   :  { %997 = vmatpush3.bf16.msra.mxu0 %v1142_v9  ;;  %v1159_v26 = vld [vmem:[#allocation5 + $0xc8] sm:$0xff]   ;;  %v1163_v30 = vld [vmem:[#allocation5 + $0xc0] sm:$0xff]   ;;  %v1170_v39 = vld [vmem:[#allocation5 + $0x138] sm:$0xff]  }
  0x3e   :  { %998 = vmatprep.subr.bf16.mxu0 %v1145_v12  ;;  %v1160_v27 = vld [vmem:[#allocation5 + $0x88] sm:$0xff]   ;;  %v1166_v34 = vld [vmem:[#allocation5 + $0x80] sm:$0xff]   ;;  %v1171_v40 = vld [vmem:[#allocation5 + $0x170] sm:$0xff]  }
  0x3f   :  { %1019 = vmatpush3.bf16.msra.mxu1 %v1144_v11  ;;  %v81_v31 = vld [vmem:[#allocation2] sm:$0xff]  ;;  %v82_v36 = vld [vmem:[#allocation2 + $0x8] sm:$0xff]  ;;  %v1177_v47 = vld [vmem:[#allocation5 + $0x158] sm:$0xff]  }
  0x40   :  { %1020 = vmatprep.subr.bf16.mxu1 %v1147_v14  ;;  %v917_v32 = vcombine.low %v81_v31, %v81_v31  ;;  %v918_v33 = vcombine.high %v81_v31, %v81_v31  ;;  %v919_v37 = vcombine.low %v82_v36, %v82_v36  ;;  %v920_v38 = vcombine.high %v82_v36, %v82_v36  ;;  %v1172_v41 = vld [vmem:[#allocation5 + $0x130] sm:$0xff]   ;;  %v1173_v42 = vld [vmem:[#allocation5 + $0x168] sm:$0xff]   ;;  %v1175_v45 = vld [vmem:[#allocation5 + $0x160] sm:$0xff]  }
  0x41   :  { %999 = vmatpush3.bf16.msra.mxu0 %v1146_v13  ;;  %v1174_v44 = vld [vmem:[#allocation5 + $0x128] sm:$0xff]   ;;  %v1176_v46 = vld [vmem:[#allocation5 + $0x120] sm:$0xff]   ;;  %v1178_v48 = vld [vmem:[#allocation5 + $0x118] sm:$0xff]  }
  0x42   :  { %1000 = vmatprep.subr.bf16.mxu0 %v1149_v16  ;;  %544 = vmatprep.mubr.bf16.mxu0 %v918_v33  ;;  %v1179_v49 = vld [vmem:[#allocation5 + $0x150] sm:$0xff]   ;;  %v1185_v50 = vld [vmem:[#allocation5 + $0x180] sm:$0xff]   ;;  %v1188_v54 = vld [vmem:[#allocation2 + $0x18] ss:$0 sps:$4 sm:$0xff]  }
  0x43   :  { %1021 = vmatpush3.bf16.msra.mxu1 %v1148_v15  ;;  %584 = vmatprep.mubr.bf16.mxu1 %v920_v38  ;;  %v83_v51 = vld [vmem:[#allocation2 + $0x10] sm:$0xff]  ;;  %v1181_v55 = vld [vmem:[#allocation5 + $0x148] sm:$0xff]   ;;  %v1183_v57 = vld [vmem:[#allocation5 + $0x140] sm:$0xff]  }
  0x44   :  { %1022 = vmatprep.subr.bf16.mxu1 %v1151_v18  ;;  %v1180_v52 = vld [vmem:[#allocation5 + $0x110] sm:$0xff]   ;;  %v922_v53 = vcombine.high %v83_v51, %v83_v51  ;;  %v1182_v56 = vld [vmem:[#allocation5 + $0x108] sm:$0xff]   ;;  %v1184_v58 = vld [vmem:[#allocation5 + $0x100] sm:$0xff]   ;;  %v921_v59 = vcombine.low %v83_v51, %v83_v51 }
  0x45   :  { %1001 = vmatpush3.bf16.msra.mxu0 %v1150_v17  ;;  %v1189_v60 = vld [vmem:[#allocation7 + $0x38] sm:$0xff]   ;;  %v1190_v61 = vld [vmem:[#allocation7 + $0x30] sm:$0xff]   ;;  %v1191_v62 = vld [vmem:[#allocation7 + $0x28] sm:$0xff]  }
  0x46   :  { %1002 = vmatprep.subr.bf16.mxu0 %v1153_v20  ;;  %v1192_v63 = vld [vmem:[#allocation7 + $0x20] sm:$0xff]   ;;  %v1193_v0 = vld [vmem:[#allocation7 + $0x18] sm:$0xff]   ;;  %v1194_v1 = vld [vmem:[#allocation7 + $0x10] sm:$0xff]  }
  0x47   :  { %1023 = vmatpush3.bf16.msra.mxu1 %v1152_v19  ;;  %v1195_v2 = vld [vmem:[#allocation7 + $0x8] sm:$0xff]   ;;  %v1196_v3 = vld [vmem:[#allocation7] sm:$0xff]   ;;  %v1197_v4 = vld [vmem:[#allocation8 + $0x38] sm:$0xff]  }
  0x48   :  { %1024 = vmatprep.subr.bf16.mxu1 %v1155_v22  ;;  %v1198_v5 = vld [vmem:[#allocation8 + $0x30] sm:$0xff]   ;;  %v1199_v6 = vld [vmem:[#allocation8 + $0x28] sm:$0xff]   ;;  %v1200_v7 = vld [vmem:[#allocation8 + $0x20] sm:$0xff]  }
  0x49   :  { %1003 = vmatpush3.bf16.msra.mxu0 %v1154_v21  ;;  %v1201_v8 = vld [vmem:[#allocation8 + $0x18] sm:$0xff]   ;;  %v1202_v9 = vld [vmem:[#allocation8 + $0x10] sm:$0xff]   ;;  %v1203_v36 = vld [vmem:[#allocation8 + $0x8] sm:$0xff]  }
  0x4a   :  { %1004 = vmatprep.subr.bf16.mxu0 %v1157_v24  ;;  %v974_v38 = vld [vmem:[%s1422_s4] ss:$0 sm:$0xff]  ;;  %s1285_s4 = scalar_lea.vmem %s906_s25, 128 }
  0x4b   :  { %1025 = vmatpush3.bf16.msra.mxu1 %v1156_v23  ;;  %v916_v23 = vld [vmem:[%s1420_s2] ss:$0 sm:$0xff]  ;;  %p1286_p6 = scmp.ne.s32.totalorder %s906_s25, %s1285_s4  ;;  %p1291_p8 = scmp.lt.s32.totalorder %s1285_s4, %s1285_s4 }
  0x4c   :  { %1026 = vmatprep.subr.bf16.mxu1 %v1159_v26 }
  0x4d   :  { %1005 = vmatpush3.bf16.msra.mxu0 %v1158_v25  ;;  %p1292_p9 = por %p1291_p8, %p1290_p7 }
  0x4e   :  { %1006 = vmatprep.subr.bf16.mxu0 %v1161_v28 }
  0x4f   :  { %1027 = vmatpush3.bf16.msra.mxu1 %v1160_v27  ;;  %p1293_p10 = pnand %p1292_p9, %p1286_p6 }
  0x50   :  { %1028 = vmatprep.subr.bf16.mxu1 %v1163_v30 }
  0x51   :  { %1007 = vmatpush3.bf16.msra.mxu0 %v1162_v29 }
  0x52   :  { %1036 = vmatprep.subr.bf16.mxu0 %v1167_v35 }
  0x53   :  { %1029 = vmatpush3.bf16.msra.mxu1 %v1166_v34 }
  0x54   :  { %545 = vmatmul.mubr.bf16.vlgmr.msra.gmra.mxu0 %v917_v32  ;;  %1078 = vmatprep.subr.bf16.mxu1 %v1319_v43 }
  0x55   :  { %1037 = vmatpush3.bf16.msra.mxu0 %v1170_v39  ;;  %624 = vmatprep.mubr.bf16.mxu0 %v922_v53 }
  0x56   :  { %585 = vmatmul.mubr.bf16.vlgmr.msra.gmra.mxu1 %v919_v37  ;;  %1038 = vmatprep.subr.bf16.mxu0 %v1171_v40  ;;  %v1204_v37 = vld [vmem:[#allocation8] sm:$0xff]  }
  0x57   :  { %1080 = vmatprep.mubr.msk.bf16.mxu1 %vm1320_vm0, %v1319_v43  ;;  %1079 = vmatpush3.bf16.msra.mxu1 %v1185_v50 }
  0x58   :  { %1084 = vmatprep.subr.bf16.mxu1 %v1319_v43 }
  0x59   :  { %1039 = vmatpush3.bf16.msra.mxu0 %v1172_v41 }
  0x5a   :  { %1040 = vmatprep.subr.bf16.mxu0 %v1173_v42 }
  0x5d   :  { %1041 = vmatpush3.bf16.msra.mxu0 %v1174_v44 }
  0x5e   :  { %1042 = vmatprep.subr.bf16.mxu0 %v1175_v45  ;;  %1081 = vmatmul.mubr.msk.bf16.vlgmr.msra.gmra.mxu1 %vm508_vm1, %v1188_v54 }
  0x5f   :  { %1100 = vmatprep.mubr.msk.bf16.mxu1 %vm1320_vm0, %v1319_v43  ;;  %1085 = vmatpush3.bf16.msra.mxu1 %v1189_v60 }
  0x60   :  { %1086 = vmatprep.subr.bf16.mxu1 %v1319_v43 }
  0x61   :  { %1043 = vmatpush3.bf16.msra.mxu0 %v1176_v46 }
  0x62   :  { %1044 = vmatprep.subr.bf16.mxu0 %v1177_v47  ;;  %v983_v47 = vld [vmem:[%s1424_s6] ss:$0 sm:$0xff] }
  0x63   :  { %1087 = vmatpush3.bf16.msra.mxu1 %v1190_v61 }
  0x64   :  { %1088 = vmatprep.subr.bf16.mxu1 %v1319_v43 }
  0x65   :  { %1045 = vmatpush3.bf16.msra.mxu0 %v1178_v48 }
  0x66   :  { %1046 = vmatprep.subr.bf16.mxu0 %v1179_v49 }
  0x67   :  { %1089 = vmatpush3.bf16.msra.mxu1 %v1191_v62 }
  0x68   :  { %1090 = vmatprep.subr.bf16.mxu1 %v1319_v43 }
  0x69   :  { %1047 = vmatpush3.bf16.msra.mxu0 %v1180_v52 }
  0x6a   :  { %1048 = vmatprep.subr.bf16.mxu0 %v1181_v55 }
  0x6b   :  { %1091 = vmatpush3.bf16.msra.mxu1 %v1192_v63 }
  0x6c   :  { %1092 = vmatprep.subr.bf16.mxu1 %v1319_v43 }
  0x6d   :  { %1049 = vmatpush3.bf16.msra.mxu0 %v1182_v56 }
  0x6e   :  { %1050 = vmatprep.subr.bf16.mxu0 %v1183_v57 }
  0x6f   :  { %1093 = vmatpush3.bf16.msra.mxu1 %v1193_v0 }
  0x70   :  { %1094 = vmatprep.subr.bf16.mxu1 %v1319_v43 }
  0x71   :  { %1051 = vmatpush3.bf16.msra.mxu0 %v1184_v58 }
  0x72   :  { %1104 = vmatprep.subr.bf16.mxu0 %v1319_v43 }
  0x73   :  { %1095 = vmatpush3.bf16.msra.mxu1 %v1194_v1 }
  0x74   :  { %625 = vmatmul.mubr.bf16.vlgmr.msra.gmra.mxu0 %v921_v59  ;;  %1096 = vmatprep.subr.bf16.mxu1 %v1319_v43 }
  0x75   :  { %1120 = vmatprep.mubr.msk.bf16.mxu0 %vm1320_vm0, %v1319_v43  ;;  %1105 = vmatpush3.bf16.msra.mxu0 %v1197_v4 }
  0x76   :  { %1106 = vmatprep.subr.bf16.mxu0 %v1319_v43 }
  0x77   :  { %1097 = vmatpush3.bf16.msra.mxu1 %v1195_v2 }
  0x78   :  { %1098 = vmatprep.subr.bf16.mxu1 %v1319_v43 }
  0x79   :  { %1107 = vmatpush3.bf16.msra.mxu0 %v1198_v5 }
  0x7a   :  { %1108 = vmatprep.subr.bf16.mxu0 %v1319_v43 }
  0x7b   :  { %1099 = vmatpush3.bf16.msra.mxu1 %v1196_v3 }
  0x7d   :  { %1109 = vmatpush3.bf16.msra.mxu0 %v1199_v6 }
  0x7e   :  { %1110 = vmatprep.subr.bf16.mxu0 %v1319_v43 }
  0x81   :  { %1111 = vmatpush3.bf16.msra.mxu0 %v1200_v7 }
  0x82   :  { %1112 = vmatprep.subr.bf16.mxu0 %v1319_v43 }
  0x85   :  { %1113 = vmatpush3.bf16.msra.mxu0 %v1201_v8 }
  0x86   :  { %1114 = vmatprep.subr.bf16.mxu0 %v1319_v43 }
  0x89   :  { %1115 = vmatpush3.bf16.msra.mxu0 %v1202_v9 }
  0x8a   :  { %1116 = vmatprep.subr.bf16.mxu0 %v1319_v43 }
  0x8d   :  { %1117 = vmatpush3.bf16.msra.mxu0 %v1203_v36 }
  0x8e   :  { %1118 = vmatprep.subr.bf16.mxu0 %v1319_v43 }
  0x91   :  { %1119 = vmatpush3.bf16.msra.mxu0 %v1204_v37 }
 0x114   :  { %v1008_v10 = vpop.f32.mrf.mxu0 }
 0x116   :  { %v1009_v11 = vpop.f32.mrf.mxu0  ;;  %v1030_v12 = vpop.f32.mrf.mxu1 }
 0x117   :  { %v1010_v22 = vadd.f32 %v1009_v11, %v1008_v10 }
 0x118   :  { %v1011_v13 = vpop.f32.mrf.mxu0  ;;  %v1031_v14 = vpop.f32.mrf.mxu1 }
 0x119   :  { %v547_v24 = vadd.f32 %v1010_v22, %v916_v23  ;;  %v1032_v25 = vadd.f32 %v1031_v14, %v1030_v12 }
 0x11a   :  { %v1012_v15 = vpop.f32.mrf.mxu0  ;;  %v1033_v16 = vpop.f32.mrf.mxu1 }
 0x11b   :  { %v587_v28 = vadd.f32 %v1032_v25, %v547_v24 }
 0x11c   :  { %v1034_v17 = vpop.f32.mrf.mxu1 }
 0x11e   :  { %v666_v18 = vpop.f32.mrf.mxu1 }
 0x120   :  { %v1082_v19 = vpop.f32.mrf.mxu1 }
 0x122   :  { %v669_v20 = vpop.f32.mrf.mxu1 }
 0x124   :  { %v1083_v21 = vpop.f32.mrf.mxu1 }
 0x134   :  { %v1052_v26 = vpop.f32.mrf.mxu0 }
 0x136   :  { %v1053_v27 = vpop.f32.mrf.mxu0 }
 0x137   :  { %v1054_v29 = vadd.f32 %v1053_v27, %v1052_v26 }
 0x138   :  { %v1055_v30 = vpop.f32.mrf.mxu0 }
 0x139   :  { %v627_v31 = vadd.f32 %v1054_v29, %v587_v28 }
 0x13a   :  { %v1056_v32 = vpop.f32.mrf.mxu0 }
 0x13b   :  { %v667_v33 = vadd.f32 %v666_v18, %v627_v31 }
 0x13d   :  { %v672_v34 = vmax.f32 %v667_v33, 0.0 }
 0x13f   :  { %v673_v35 = vpack.c.bf16 %v672_v34, %v672_v34 }
 0x141   :  { %1101 = vmatmul.mubr.bf16.vlgmr.msra.gmra.mxu1 %v673_v35 }
 0x201   :  { %v779_v39 = vpop.f32.mrf.mxu1 }
 0x202   :  { %v780_v40 = vadd.f32 %v974_v38, %v779_v39 }
 0x203   :  { %v1102_v41 = vpop.f32.mrf.mxu1 }
 0x204   :  { %v785_v42 = vmax.f32 %v780_v40, 0.0 }
 0x205   :  { %v782_v44 = vpop.f32.mrf.mxu1 }
 0x206   :  { %v786_v45 = vpack.c.bf16 %v785_v42, %v785_v42 }
 0x207   :  { %v1103_v46 = vpop.f32.mrf.mxu1 }
 0x208   :  { %1121 = vmatmul.mubr.bf16.vlgmr.msra.gmra.mxu0 %v786_v45 }
 0x2c8   :  { %v892_v43 = vpop.f32.mrf.mxu0 }
 0x2c9   :  { %v893_v48 = vadd.f32 %v983_v47, %v892_v43 }
 0x2ca   :  { %v1122_v49 = vpop.f32.mrf.mxu0 }
 0x2cb   :  { %898 = vst [vmem:[#allocation10] sm:$0xff] %v893_v48 }
 0x2cc   :  { %v895_v50 = vpop.f32.mrf.mxu0 }
 0x2cd   :  { %1296 = shalt.err (!%p1293_p10)
}
 0x2ce   :  { %908 = dma.vmem_to_hbm [thread:$0]  %s906_s25, 128, %s1425_s7, [#allocation4]   ;;  %v1123_v51 = vpop.f32.mrf.mxu0 }
 0x2cf   :  { %1311 = dma.done.wait [#allocation4], 128  }
 0x2d0   :  { %1312 = vsyncadd [#allocation4], 4294967168 }
 0x2d1   :  { %912 = vsyncpa [#allocation3], 1 }
 0x2d2   :  { %913 = vsyncpa [#allocation6], 1 }
 0x2d3   :  { %914 = vsyncpa [#allocation9], 1 }
 0x2d4   :  { %915 = vsyncpa [#allocation4], 1 }

</bundles_post_ra>
